<compile_context>
chip_gen: v6e
topology: v6e:2x2x1
jax: 0.10.0
libtpu: 0.0.40
codegen_flags: <defaults>
</compile_context>

<pallas_src>
import math
from functools import partial

import jax
import jax.numpy as jnp
from jax.experimental import pallas as pl
from jax.experimental.pallas import tpu as pltpu


def _pad8(n: int) -> int:
    return ((int(n) + 7) // 8) * 8


# ----------------------------------------------------------------------------
# Fused forward kernel (single invocation, no grid, everything in VMEM)
# ----------------------------------------------------------------------------
def _fused_vae_kernel(x_ref, eps_ref, w_ref, b_ref, recon_ref, meansig_ref,
                      *, enc_plan, head_plan, dec_plan, code, out_dim):
    # spec = (row_off, k_store, n_store, bias_row, relu, n_true) -- all static.
    def dense(h, spec, relu):
        r0, k, n, brow = spec[0], spec[1], spec[2], spec[3]
        w = w_ref[r0:r0 + k, :n]            # static sub-view of the packed slab
        b = b_ref[brow:brow + 1, :n]        # (1, n) bias row
        y = jnp.dot(h, w, preferred_element_type=jnp.float32) + b
        return jnp.maximum(y, 0.0) if relu else y

    # encode: 6 per-channel Linear+ReLU folded into one block-diagonal matmul,
    # then the encoder MLP (all ReLU).
    h = x_ref[...]
    for spec in enc_plan:
        h = dense(h, spec, True)

    # fused mean | log_sigma head: one matmul, split in-register.
    ms = dense(h, head_plan, False)
    mean = ms[:, :code]
    log_sigma = ms[:, code:2 * code]

    # reparametrize: z = mean + eps * exp(log_sigma)   (exp rides the EUP slot)
    z = mean + eps_ref[...] * jnp.exp(log_sigma)

    # decode: MLP (ReLU on all but last) then block-diagonal dnn_u
    d = z
    for spec in dec_plan:
        d = dense(d, spec, spec[4])

    recon_ref[...] = d[:, :out_dim].astype(recon_ref.dtype)
    meansig_ref[...] = ms[:, :2 * code].astype(meansig_ref.dtype)


def vae_forward(arrays, x, eps, *, meta):
    """x: (B, 6, L) f32; eps: (B, code) standard-normal noise.

    Returns (recon (B,6,L), mean (B,1,code), log_sigma (B,1,code)), matching
    VAE.forward.
    """
    B, C, L = x.shape
    code = meta["code"]
    x_flat = x.reshape(B, C * L)        # channel c occupies columns [c*L, (c+1)*L)
    w_slab, b_slab = arrays["w_slab"], arrays["b_slab"]

    in_bytes = 4 * (x_flat.size + eps.size + w_slab.size + b_slab.size)
    out_bytes = 4 * (B * C * L + B * 2 * code)
    cost = pl.CostEstimate(flops=int(B * meta["flops_per_row"]),
                           transcendentals=int(B * code),
                           bytes_accessed=int(in_bytes + out_bytes))

    recon_flat, meansig = pl.pallas_call(
        partial(_fused_vae_kernel,
                enc_plan=meta["enc_plan"], head_plan=meta["head_plan"],
                dec_plan=meta["dec_plan"], code=code, out_dim=C * L),
        out_shape=(
            jax.ShapeDtypeStruct((B, C * L), x.dtype),      # lane-dense recon slab
            jax.ShapeDtypeStruct((B, 2 * code), x.dtype),   # mean | log_sigma fused
        ),
        in_specs=[pl.BlockSpec(memory_space=pltpu.MemorySpace.VMEM)] * 4,
        out_specs=(pl.BlockSpec(memory_space=pltpu.MemorySpace.VMEM),) * 2,
        cost_estimate=cost,
    )(x_flat, eps, w_slab, b_slab)

    recon = recon_flat.reshape(B, C, L)                     # torch.cat(..., dim=1)
    mean = meansig[:, :code].reshape(B, 1, code)
    log_sigma = meansig[:, code:].reshape(B, 1, code)
    return recon, mean, log_sigma


# ----------------------------------------------------------------------------
# Deterministic parameter construction (shapes mirror VAE.__init__)
# ----------------------------------------------------------------------------
def _init_linear(key, fan_in, fan_out):
    kw, kb = jax.random.split(key)
    bound = 1.0 / math.sqrt(fan_in)
    w = jax.random.uniform(kw, (fan_in, fan_out), jnp.float32, -bound, bound)
    b = jax.random.uniform(kb, (fan_out,), jnp.float32, -bound, bound)
    return w, b


def _block_diag(blocks):
    rows = sum(b.shape[0] for b in blocks)
    cols = sum(b.shape[1] for b in blocks)
    out = jnp.zeros((rows, cols), blocks[0].dtype)
    r = c = 0
    for blk in blocks:
        out = out.at[r:r + blk.shape[0], c:c + blk.shape[1]].set(blk)
        r += blk.shape[0]
        c += blk.shape[1]
    return out


def make_params(key, vect_length, num_layer, code_length):
    step = vect_length // 8
    stacked = 6 * step
    ds = (stacked / code_length) ** (1.0 / num_layer)
    keys = iter(jax.random.split(key, 64))
    p = {}

    # dnn_1..dnn_6 : Linear(L, L//8) + ReLU
    dnn_w, dnn_b = [], []
    for _ in range(6):
        w, b = _init_linear(next(keys), vect_length, step)
        dnn_w.append(w)
        dnn_b.append(b.reshape(1, step))
    p["dnn_w"] = jnp.stack(dnn_w)                    # (6, L, step)   reference only
    p["dnn_b"] = jnp.stack(dnn_b)                    # (6, 1, step)
    p["dnn_bd_w"] = _block_diag(dnn_w)               # (6L, 6*step)   fused
    p["dnn_bd_b"] = jnp.concatenate(dnn_b, axis=-1)  # (1, 6*step)

    # encoder MLP (same int(// ds**i) arithmetic as the torch __init__)
    enc = []
    for i in range(num_layer - 1):
        din = int(stacked // ds ** i)
        dout = int(stacked // ds ** (i + 1))
        w, b = _init_linear(next(keys), din, dout)
        enc.append((w, b.reshape(1, dout)))
    p["encoder"] = enc
    enc_last = int(stacked // ds ** (num_layer - 1))
    wm, bm = _init_linear(next(keys), enc_last, code_length)
    p["tomean"] = (wm, bm.reshape(1, code_length))
    ws, bs = _init_linear(next(keys), enc_last, code_length)
    p["tosigma"] = (ws, bs.reshape(1, code_length))

    # decoder MLP
    dec = []
    for i in range(num_layer - 1):
        din = int(code_length * ds ** i)
        dout = int(code_length * ds ** (i + 1))
        w, b = _init_linear(next(keys), din, dout)
        dec.append((w, b.reshape(1, dout)))
    w, b = _init_linear(next(keys), int(code_length * ds ** (num_layer - 1)), stacked)
    dec.append((w, b.reshape(1, stacked)))
    p["decoder"] = dec

    # dnn_u1..dnn_u6 : Linear(L//8, L), no activation
    du_w, du_b = [], []
    for _ in range(6):
        w, b = _init_linear(next(keys), step, vect_length)
        du_w.append(w)
        du_b.append(b.reshape(1, vect_length))
    p["dnn_u_w"] = jnp.stack(du_w)                    # (6, step, L)   reference only
    p["dnn_u_b"] = jnp.stack(du_b)                    # (6, 1, L)
    p["dnn_u_bd_w"] = _block_diag(du_w)               # (6*step, 6L)   fused
    p["dnn_u_bd_b"] = jnp.concatenate(du_b, axis=-1)  # (1, 6L)
    return p


# ----------------------------------------------------------------------------
# Host-side packing: one weight slab + one bias slab + static per-layer plan
# ----------------------------------------------------------------------------
def pack_params(p, vect_length, code_length, in_channel=6):
    C = in_channel

    # execution-ordered chain of (W (K,N), b (N,), relu?)
    chain = [(p["dnn_bd_w"], p["dnn_bd_b"].reshape(-1), True)]
    for w, b in p["encoder"]:
        chain.append((w, b.reshape(-1), True))
    head_w = jnp.concatenate([p["tomean"][0], p["tosigma"][0]], axis=1)
    head_b = jnp.concatenate([p["tomean"][1].reshape(-1),
                              p["tosigma"][1].reshape(-1)])
    chain.append((head_w, head_b, False))                          # fused heads
    n_dec = len(p["decoder"])
    for i, (w, b) in enumerate(p["decoder"]):
        chain.append((w, b.reshape(-1), i < n_dec - 1))
    chain.append((p["dnn_u_bd_w"], p["dnn_u_bd_b"].reshape(-1), False))

    head_idx = 1 + len(p["encoder"])
    n_max = max(_pad8(w.shape[1]) for (w, _, _) in chain)

    specs, blocks = [], []
    row_off = 0
    prev = C * vect_length                       # width of incoming activation
    for idx, (w, b, relu) in enumerate(chain):
        if idx == head_idx + 1:                  # decoder chain restarts from z
            prev = code_length
        k_true, n_true = int(w.shape[0]), int(w.shape[1])
        assert prev >= k_true, "padded activation narrower than layer fan-in"
        k_store, n_store = int(prev), _pad8(n_true)
        wp = jnp.zeros((k_store, n_store), jnp.float32).at[:k_true, :n_true].set(w)
        specs.append((int(row_off), k_store, n_store, int(idx), bool(relu), n_true))
        blocks.append(wp)
        row_off += _pad8(k_store)                # keep sublane-aligned offsets
        prev = n_store

    w_slab = jnp.zeros((_pad8(row_off), n_max), jnp.float32)
    for spec, blk in zip(specs, blocks):
        w_slab = w_slab.at[spec[0]:spec[0] + blk.shape[0], :blk.shape[1]].set(blk)

    b_slab = jnp.zeros((_pad8(len(chain)), n_max), jnp.float32)
    for idx, (_, b, _) in enumerate(chain):
        b_slab = b_slab.at[idx, :b.shape[0]].set(b)

    meta = dict(
        enc_plan=tuple(specs[:head_idx]),
        head_plan=specs[head_idx],
        dec_plan=tuple(specs[head_idx + 1:]),
        code=int(code_length),
        out_dim=int(C * vect_length),
        flops_per_row=int(2 * sum(s[1] * s[2] for s in specs)),
    )
    return {"w_slab": w_slab, "b_slab": b_slab}, meta


# ----------------------------------------------------------------------------
# Pure-JAX reference (mirrors the torch forward literally, per-channel)
# ----------------------------------------------------------------------------
def ref_forward(p, x, eps):
    hp = jax.lax.Precision.HIGHEST
    step = p["dnn_w"].shape[-1]
    codes = [jnp.maximum(jnp.dot(x[:, c, :], p["dnn_w"][c], precision=hp) + p["dnn_b"][c], 0.0)
             for c in range(6)]
    h = jnp.concatenate(codes, axis=-1)
    for w, b in p["encoder"]:
        h = jnp.maximum(jnp.dot(h, w, precision=hp) + b, 0.0)
    mean = jnp.dot(h, p["tomean"][0], precision=hp) + p["tomean"][1]
    log_sigma = jnp.dot(h, p["tosigma"][0], precision=hp) + p["tosigma"][1]
    z = mean + eps * jnp.exp(log_sigma)
    d = z
    for i, (w, b) in enumerate(p["decoder"]):
        d = jnp.dot(d, w, precision=hp) + b
        if i < len(p["decoder"]) - 1:
            d = jnp.maximum(d, 0.0)
    outs = [jnp.dot(d[:, c * step:(c + 1) * step], p["dnn_u_w"][c], precision=hp) + p["dnn_u_b"][c]
            for c in range(6)]
    recon = jnp.stack(outs, axis=1)
    return recon, mean, log_sigma


# ----------------------------------------------------------------------------
if __name__ == "__main__":
    key = jax.random.PRNGKey(0)
    kp, kx, ke = jax.random.split(key, 3)

    # small, forward-consistent shapes: vect_length divisible by 8, 6 channels.
    vect_length, num_layer, code_length = 64, 2, 16
    B = 8    # fills all f32 sublanes of a vreg row

    params = make_params(kp, vect_length, num_layer, code_length)
    arrays, meta = pack_params(params, vect_length, code_length)

    x = jax.random.normal(kx, (B, 6, vect_length), jnp.float32)
    eps = jax.random.normal(ke, (B, code_length), jnp.float32)  # torch.randn_like(log_sigma)

    fwd = jax.jit(partial(vae_forward, meta=meta))
    recon, mean, log_std = fwd(arrays, x, eps)
    jax.block_until_ready((recon, mean, log_std))

    assert recon.shape == (B, 6, vect_length)
    assert mean.shape == (B, 1, code_length)
    assert log_std.shape == (B, 1, code_length)

    # correctness check against the per-channel pure-JAX reference
    r_ref, m_ref, s_ref = ref_forward(params, x, eps)
    assert jnp.allclose(recon, r_ref, atol=2e-3, rtol=2e-3)
    assert jnp.allclose(mean, m_ref.reshape(B, 1, -1), atol=2e-3, rtol=2e-3)
    assert jnp.allclose(log_std, s_ref.reshape(B, 1, -1), atol=2e-3, rtol=2e-3)

    print("KERNEL_OK")
</pallas_src>

<mosaic_0001>
module attributes {stable_mosaic.version = 11 : i64} {
  func.func @_fused_vae_kernel(%arg0: memref<8x384xf32, #tpu.memory_space<vmem>>, %arg1: memref<8x16xf32, #tpu.memory_space<vmem>>, %arg2: memref<560x384xf32, #tpu.memory_space<vmem>>, %arg3: memref<8x384xf32, #tpu.memory_space<vmem>>, %arg4: memref<8x384xf32, #tpu.memory_space<vmem>>, %arg5: memref<8x32xf32, #tpu.memory_space<vmem>>) attributes {dimension_semantics = [], scalar_prefetch = 0 : i64, scratch_operands = 0 : i64, tpu.core_type = #tpu.core_type<tc>} {
    %c0 = arith.constant 0 : index
    %c0_0 = arith.constant 0 : index
    %0 = vector.load %arg0[%c0, %c0_0] : memref<8x384xf32, #tpu.memory_space<vmem>>, vector<8x384xf32>
    %c0_1 = arith.constant 0 : index
    %c0_2 = arith.constant 0 : index
    %1 = vector.load %arg2[%c0_1, %c0_2] : memref<560x384xf32, #tpu.memory_space<vmem>>, vector<384x48xf32>
    %c0_3 = arith.constant 0 : index
    %c0_4 = arith.constant 0 : index
    %2 = vector.load %arg3[%c0_3, %c0_4] : memref<8x384xf32, #tpu.memory_space<vmem>>, vector<1x48xf32>
    %cst = arith.constant dense<0.000000e+00> : vector<8x48xf32>
    %3 = tpu.matmul %0, %1, %cst {dimension_numbers = #tpu.dot_dimension_numbers<[1], [0], [0], [1], [0, 0, 1, 1], [], []>} : vector<8x384xf32>, vector<384x48xf32>, vector<8x48xf32> -> vector<8x48xf32>
    %4 = vector.broadcast %2 : vector<1x48xf32> to vector<8x48xf32>
    %5 = arith.addf %3, %4 : vector<8x48xf32>
    %cst_5 = arith.constant 0.000000e+00 : f32
    %6 = vector.broadcast %cst_5 : f32 to vector<8x48xf32>
    %7 = arith.maximumf %5, %6 : vector<8x48xf32>
    %c384 = arith.constant 384 : index
    %c0_6 = arith.constant 0 : index
    %8 = vector.load %arg2[%c384, %c0_6] : memref<560x384xf32, #tpu.memory_space<vmem>>, vector<48x32xf32>
    %c1 = arith.constant 1 : index
    %c0_7 = arith.constant 0 : index
    %9 = vector.load %arg3[%c1, %c0_7] : memref<8x384xf32, #tpu.memory_space<vmem>>, vector<1x32xf32>
    %cst_8 = arith.constant dense<0.000000e+00> : vector<8x32xf32>
    %10 = tpu.matmul %7, %8, %cst_8 {dimension_numbers = #tpu.dot_dimension_numbers<[1], [0], [0], [1], [0, 0, 1, 1], [], []>} : vector<8x48xf32>, vector<48x32xf32>, vector<8x32xf32> -> vector<8x32xf32>
    %11 = vector.broadcast %9 : vector<1x32xf32> to vector<8x32xf32>
    %12 = arith.addf %10, %11 : vector<8x32xf32>
    %cst_9 = arith.constant 0.000000e+00 : f32
    %13 = vector.broadcast %cst_9 : f32 to vector<8x32xf32>
    %14 = arith.maximumf %12, %13 : vector<8x32xf32>
    %c432 = arith.constant 432 : index
    %c0_10 = arith.constant 0 : index
    %15 = vector.load %arg2[%c432, %c0_10] : memref<560x384xf32, #tpu.memory_space<vmem>>, vector<32x32xf32>
    %c2 = arith.constant 2 : index
    %c0_11 = arith.constant 0 : index
    %16 = vector.load %arg3[%c2, %c0_11] : memref<8x384xf32, #tpu.memory_space<vmem>>, vector<1x32xf32>
    %cst_12 = arith.constant dense<0.000000e+00> : vector<8x32xf32>
    %17 = tpu.matmul %14, %15, %cst_12 {dimension_numbers = #tpu.dot_dimension_numbers<[1], [0], [0], [1], [0, 0, 1, 1], [], []>} : vector<8x32xf32>, vector<32x32xf32>, vector<8x32xf32> -> vector<8x32xf32>
    %18 = vector.broadcast %16 : vector<1x32xf32> to vector<8x32xf32>
    %19 = arith.addf %17, %18 : vector<8x32xf32>
    %20 = vector.extract_strided_slice %19 {offsets = [0, 0], sizes = [8, 16], strides = [1, 1]} : vector<8x32xf32> to vector<8x16xf32>
    %21 = vector.extract_strided_slice %19 {offsets = [0, 16], sizes = [8, 16], strides = [1, 1]} : vector<8x32xf32> to vector<8x16xf32>
    %c0_13 = arith.constant 0 : index
    %c0_14 = arith.constant 0 : index
    %22 = vector.load %arg1[%c0_13, %c0_14] : memref<8x16xf32, #tpu.memory_space<vmem>>, vector<8x16xf32>
    %23 = math.exp %21 : vector<8x16xf32>
    %24 = arith.mulf %22, %23 : vector<8x16xf32>
    %25 = arith.addf %20, %24 : vector<8x16xf32>
    %c464 = arith.constant 464 : index
    %c0_15 = arith.constant 0 : index
    %26 = vector.load %arg2[%c464, %c0_15] : memref<560x384xf32, #tpu.memory_space<vmem>>, vector<16x32xf32>
    %c3 = arith.constant 3 : index
    %c0_16 = arith.constant 0 : index
    %27 = vector.load %arg3[%c3, %c0_16] : memref<8x384xf32, #tpu.memory_space<vmem>>, vector<1x32xf32>
    %cst_17 = arith.constant dense<0.000000e+00> : vector<8x32xf32>
    %28 = tpu.matmul %25, %26, %cst_17 {dimension_numbers = #tpu.dot_dimension_numbers<[1], [0], [0], [1], [0, 0, 1, 1], [], []>} : vector<8x16xf32>, vector<16x32xf32>, vector<8x32xf32> -> vector<8x32xf32>
    %29 = vector.broadcast %27 : vector<1x32xf32> to vector<8x32xf32>
    %30 = arith.addf %28, %29 : vector<8x32xf32>
    %cst_18 = arith.constant 0.000000e+00 : f32
    %31 = vector.broadcast %cst_18 : f32 to vector<8x32xf32>
    %32 = arith.maximumf %30, %31 : vector<8x32xf32>
    %c480 = arith.constant 480 : index
    %c0_19 = arith.constant 0 : index
    %33 = vector.load %arg2[%c480, %c0_19] : memref<560x384xf32, #tpu.memory_space<vmem>>, vector<32x48xf32>
    %c4 = arith.constant 4 : index
    %c0_20 = arith.constant 0 : index
    %34 = vector.load %arg3[%c4, %c0_20] : memref<8x384xf32, #tpu.memory_space<vmem>>, vector<1x48xf32>
    %cst_21 = arith.constant dense<0.000000e+00> : vector<8x48xf32>
    %35 = tpu.matmul %32, %33, %cst_21 {dimension_numbers = #tpu.dot_dimension_numbers<[1], [0], [0], [1], [0, 0, 1, 1], [], []>} : vector<8x32xf32>, vector<32x48xf32>, vector<8x48xf32> -> vector<8x48xf32>
    %36 = vector.broadcast %34 : vector<1x48xf32> to vector<8x48xf32>
    %37 = arith.addf %35, %36 : vector<8x48xf32>
    %c512 = arith.constant 512 : index
    %c0_22 = arith.constant 0 : index
    %38 = vector.load %arg2[%c512, %c0_22] : memref<560x384xf32, #tpu.memory_space<vmem>>, vector<48x384xf32>
    %c5 = arith.constant 5 : index
    %c0_23 = arith.constant 0 : index
    %39 = vector.load %arg3[%c5, %c0_23] : memref<8x384xf32, #tpu.memory_space<vmem>>, vector<1x384xf32>
    %cst_24 = arith.constant dense<0.000000e+00> : vector<8x384xf32>
    %40 = tpu.matmul %37, %38, %cst_24 {dimension_numbers = #tpu.dot_dimension_numbers<[1], [0], [0], [1], [0, 0, 1, 1], [], []>} : vector<8x48xf32>, vector<48x384xf32>, vector<8x384xf32> -> vector<8x384xf32>
    %41 = vector.broadcast %39 : vector<1x384xf32> to vector<8x384xf32>
    %42 = arith.addf %40, %41 : vector<8x384xf32>
    %c0_25 = arith.constant 0 : index
    %c0_26 = arith.constant 0 : index
    %43 = vector.load %arg4[%c0_25, %c0_26] : memref<8x384xf32, #tpu.memory_space<vmem>>, vector<8x384xf32>
    tpu.vector_store %arg4[%c0_25, %c0_26], %42 {strides = array<i32>} : memref<8x384xf32, #tpu.memory_space<vmem>>, vector<8x384xf32>,
    %c0_27 = arith.constant 0 : index
    %c0_28 = arith.constant 0 : index
    %44 = vector.load %arg5[%c0_27, %c0_28] : memref<8x32xf32, #tpu.memory_space<vmem>>, vector<8x32xf32>
    tpu.vector_store %arg5[%c0_27, %c0_28], %19 {strides = array<i32>} : memref<8x32xf32, #tpu.memory_space<vmem>>, vector<8x32xf32>,
    return
  }
}

</mosaic_0001>

<bundles_post_ra>
// kernel: vae_forward.1
= control target key start
LH: loop header
LB: loop body
LE: loop exit
PB: predicated region body
PF: predicated region fallthrough
CT: control target
= control target key end

     0   :  { %11 = vsyncpa [#allocation3], 0  ;;  %s955_s18 = smov [#allocation2]   ;;  %s1093_s0 = inlined_call_operand.vmem [shape: f32[8,384], index: 0, kind: input, shape index: {}]   ;;  %s1094_s1 = inlined_call_operand.vmem [shape: f32[8,16], index: 1, kind: input, shape index: {}]   ;;  %s1095_s2 = inlined_call_operand.hbm [shape: f32[560,384], index: 2, kind: input, shape index: {}]   ;;  %s1096_s3 = inlined_call_operand.vmem [shape: f32[8,384], index: 3, kind: input, shape index: {}]   ;;  %s1097_s4 = inlined_call_operand.vmem [shape: f32[8,384], index: 4, kind: output, shape index: {0}]   ;;  %s1098_s5 = inlined_call_operand.vmem [shape: f32[8,32], index: 5, kind: output, shape index: {1}]  }
   0x1   :  { %s21_s19 = sshll.u32 %s955_s18, 4  ;;  %s22_s19 = int_to_ptr.vmem [resolvable:$true] %s21_s19 }
   0x2   :  { %s941_s20 = scalar_lea.vmem %s22_s19, 26880  ;;  %p946_p1 = scmp.lt.s32.totalorder %s22_s19, %s22_s19 }
   0x3   :  { %p942_p0 = scmp.ne.s32.totalorder %s22_s19, %s941_s20  ;;  %p947_p2 = scmp.lt.s32.totalorder %s941_s20, %s941_s20 }
   0x5   :  { %p948_p3 = por %p947_p2, %p946_p1 }
   0x7   :  { %p949_p4 = pnand %p948_p3, %p942_p0 }
   0x9   :  { %952 = shalt.err (!%p949_p4)
}
   0xa   :  { %s956_s21 = smov 384   ;;  %s957_s22 = smov 24  }
   0xb   :  { %27 = dma.hbm_to_vmem [thread:$0]  %s1095_s2, 26880, %s22_s19, [#allocation3], %s956_s21, %s956_s21, %s957_s22  }
   0xc   :  { %953 = dma.done.wait [#allocation3], 26880  }
   0xd   :  { %954 = vsyncadd [#allocation3], 4294940416  ;;  %v958_v0 = vmov 0.0   ;;  %vm959_vm0 = vmmov 0   ;;  %v67_v1 = vld [vmem:[#allocation2 + $0x2e8] sm:$0xff]  ;;  %v66_v3 = vld [vmem:[#allocation2 + $0x2d0] sm:$0xff] }
   0xe   :  { %831 = vmatprep.subr.mxu1 %v958_v0  ;;  %863 = vmatprep.mubr.msk.f32.mxu1 %vm959_vm0, %v958_v0  ;;  %v51_v2 = vld [vmem:[#allocation2 + $0x168] sm:$0xff]  ;;  %v50_v4 = vld [vmem:[#allocation2 + $0x150] sm:$0xff]  ;;  %v65_v5 = vld [vmem:[#allocation2 + $0x2b8] sm:$0xff]  ;;  %vm233_vm1 = vcmask 392192   ;;  %vm313_vm2 = vcmask 261120   ;;  %s960_s12 = smov 112  }
   0xf   :  { %752 = vmatprep.subr.mxu0 %v67_v1  ;;  %v83_v6 = vld [vmem:[#allocation2 + $0x468] sm:$0xff]  ;;  %v49_v7 = vld [vmem:[#allocation2 + $0x138] sm:$0xff]  ;;  %v82_v8 = vld [vmem:[#allocation2 + $0x450] sm:$0xff]  ;;  %vm399_vm3 = vcmask 130048  }
  0x10   :  { %753 = vmatpush3.msra.mxu0 %v51_v2  ;;  %832 = vmatpush3.msra.mxu1 %v83_v6  ;;  %v64_v9 = vld [vmem:[#allocation2 + $0x2a0] sm:$0xff]  ;;  %v81_v10 = vld [vmem:[#allocation2 + $0x438] sm:$0xff]  ;;  %v63_v12 = vld [vmem:[#allocation2 + $0x288] sm:$0xff] }
  0x11   :  { %754 = vmatprep.subr.mxu0 %v66_v3  ;;  %833 = vmatprep.subr.mxu1 %v958_v0  ;;  %v48_v11 = vld [vmem:[#allocation2 + $0x120] sm:$0xff]  ;;  %v47_v14 = vld [vmem:[#allocation2 + $0x108] sm:$0xff]  ;;  %v62_v15 = vld [vmem:[#allocation2 + $0x270] sm:$0xff] }
  0x12   :  { %755 = vmatpush3.msra.mxu0 %v50_v4  ;;  %834 = vmatpush3.msra.mxu1 %v82_v8  ;;  %v80_v13 = vld [vmem:[#allocation2 + $0x420] sm:$0xff]  ;;  %v79_v16 = vld [vmem:[#allocation2 + $0x408] sm:$0xff]  ;;  %v46_v17 = vld [vmem:[#allocation2 + $0xf0] sm:$0xff] }
  0x13   :  { %756 = vmatprep.subr.mxu0 %v65_v5  ;;  %835 = vmatprep.subr.mxu1 %v958_v0  ;;  %v61_v18 = vld [vmem:[#allocation2 + $0x258] sm:$0xff]  ;;  %v78_v19 = vld [vmem:[#allocation2 + $0x3f0] sm:$0xff]  ;;  %v60_v21 = vld [vmem:[#allocation2 + $0x240] sm:$0xff] }
  0x14   :  { %757 = vmatpush3.msra.mxu0 %v49_v7  ;;  %836 = vmatpush3.msra.mxu1 %v81_v10  ;;  %v45_v20 = vld [vmem:[#allocation2 + $0xd8] sm:$0xff]  ;;  %v44_v23 = vld [vmem:[#allocation2 + $0xc0] sm:$0xff]  ;;  %v59_v24 = vld [vmem:[#allocation2 + $0x228] sm:$0xff] }
  0x15   :  { %758 = vmatprep.subr.mxu0 %v64_v9  ;;  %837 = vmatprep.subr.mxu1 %v958_v0  ;;  %v77_v22 = vld [vmem:[#allocation2 + $0x3d8] sm:$0xff]  ;;  %v76_v25 = vld [vmem:[#allocation2 + $0x3c0] sm:$0xff]  ;;  %v43_v26 = vld [vmem:[#allocation2 + $0xa8] sm:$0xff] }
  0x16   :  { %759 = vmatpush3.msra.mxu0 %v48_v11  ;;  %838 = vmatpush3.msra.mxu1 %v80_v13  ;;  %v58_v27 = vld [vmem:[#allocation2 + $0x210] sm:$0xff]  ;;  %v75_v28 = vld [vmem:[#allocation2 + $0x3a8] sm:$0xff]  ;;  %v57_v30 = vld [vmem:[#allocation2 + $0x1f8] sm:$0xff] }
  0x17   :  { %760 = vmatprep.subr.mxu0 %v63_v12  ;;  %839 = vmatprep.subr.mxu1 %v958_v0  ;;  %v42_v29 = vld [vmem:[#allocation2 + $0x90] sm:$0xff]  ;;  %v41_v32 = vld [vmem:[#allocation2 + $0x78] sm:$0xff]  ;;  %v56_v33 = vld [vmem:[#allocation2 + $0x1e0] sm:$0xff] }
  0x18   :  { %761 = vmatpush3.msra.mxu0 %v47_v14  ;;  %840 = vmatpush3.msra.mxu1 %v79_v16  ;;  %v74_v31 = vld [vmem:[#allocation2 + $0x390] sm:$0xff]  ;;  %v73_v34 = vld [vmem:[#allocation2 + $0x378] sm:$0xff]  ;;  %v40_v35 = vld [vmem:[#allocation2 + $0x60] sm:$0xff] }
  0x19   :  { %762 = vmatprep.subr.mxu0 %v62_v15  ;;  %841 = vmatprep.subr.mxu1 %v958_v0  ;;  %v55_v36 = vld [vmem:[#allocation2 + $0x1c8] sm:$0xff]  ;;  %v72_v37 = vld [vmem:[#allocation2 + $0x360] sm:$0xff]  ;;  %v54_v39 = vld [vmem:[#allocation2 + $0x1b0] sm:$0xff] }
  0x1a   :  { %763 = vmatpush3.msra.mxu0 %v46_v17  ;;  %842 = vmatpush3.msra.mxu1 %v78_v19  ;;  %v39_v38 = vld [vmem:[#allocation2 + $0x48] sm:$0xff]  ;;  %v38_v41 = vld [vmem:[#allocation2 + $0x30] sm:$0xff]  ;;  %v53_v42 = vld [vmem:[#allocation2 + $0x198] sm:$0xff] }
  0x1b   :  { %764 = vmatprep.subr.mxu0 %v61_v18  ;;  %843 = vmatprep.subr.mxu1 %v958_v0  ;;  %v71_v40 = vld [vmem:[#allocation2 + $0x348] sm:$0xff]  ;;  %v37_v44 = vld [vmem:[#allocation2 + $0x18] sm:$0xff]  ;;  %v70_v45 = vld [vmem:[#allocation2 + $0x330] sm:$0xff] }
  0x1c   :  { %765 = vmatpush3.msra.mxu0 %v45_v20  ;;  %844 = vmatpush3.msra.mxu1 %v77_v22  ;;  %v34_v43 = vld [vmem:[%s1093_s0 + $0x8] sm:$0xff]  ;;  %v52_v46 = vld [vmem:[#allocation2 + $0x180] sm:$0xff]  ;;  %v69_v48 = vld [vmem:[#allocation2 + $0x318] sm:$0xff] }
  0x1d   :  { %766 = vmatprep.subr.mxu0 %v60_v21  ;;  %845 = vmatprep.subr.mxu1 %v958_v0  ;;  %v36_v47 = vld [vmem:[#allocation2] sm:$0xff]  ;;  %v35_v51 = vld [vmem:[%s1093_s0 + $0x10] sm:$0xff]  ;;  %v231_v52 = vld [vmem:[#allocation2 + $0x4f8] sm:$0xff] }
  0x1e   :  { %767 = vmatpush3.msra.mxu0 %v44_v23  ;;  %846 = vmatpush3.msra.mxu1 %v76_v25  ;;  %v33_v49 = vld [vmem:[%s1093_s0] sm:$0xff]  ;;  %v229_v54 = vld [vmem:[#allocation2 + $0x4c8] sm:$0xff]  ;;  %v228_v55 = vld [vmem:[#allocation2 + $0x4b0] sm:$0xff] }
  0x1f   :  { %768 = vmatprep.subr.mxu0 %v59_v24  ;;  %847 = vmatprep.subr.mxu1 %v958_v0  ;;  %v68_v50 = vld [vmem:[#allocation2 + $0x300] sm:$0xff]  ;;  %v227_v56 = vld [vmem:[#allocation2 + $0x498] sm:$0xff]  ;;  %v309_v6 = vld [vmem:[#allocation2 + $0x528] sm:$0xff] }
  0x20   :  { %769 = vmatpush3.msra.mxu0 %v43_v26  ;;  %848 = vmatpush3.msra.mxu1 %v75_v28  ;;  %v230_v53 = vld [vmem:[#allocation2 + $0x4e0] sm:$0xff]  ;;  %v311_v58 = vld [vmem:[#allocation2 + $0x558] sm:$0xff]  ;;  %v308_v7 = vld [vmem:[#allocation2 + $0x510] sm:$0xff] }
  0x21   :  { %770 = vmatprep.subr.mxu0 %v58_v27  ;;  %849 = vmatprep.subr.mxu1 %v958_v0  ;;  %v226_v57 = vld [vmem:[#allocation2 + $0x480] sm:$0xff]  ;;  %v397_v18 = vld [vmem:[#allocation2 + $0x588] sm:$0xff]  ;;  %v396_v19 = vld [vmem:[#allocation2 + $0x570] sm:$0xff] }
  0x22   :  { %771 = vmatpush3.msra.mxu0 %v42_v29  ;;  %850 = vmatpush3.msra.mxu1 %v74_v31  ;;  %v84_v61 = vld [vmem:[%s1096_s3] ss:$0 sm:$0xff]  ;;  %v232_v8 = vld [vmem:[%s1096_s3 + $0x1] ss:$0 sm:$0xff]  ;;  %v312_v13 = vld [vmem:[%s1096_s3 + $0x2] ss:$0 sm:$0xff] }
  0x23   :  { %772 = vmatprep.subr.mxu0 %v57_v30  ;;  %851 = vmatprep.subr.mxu1 %v958_v0  ;;  %v310_v5 = vld [vmem:[#allocation2 + $0x540] sm:$0xff]  ;;  %v477_v20 = vld [vmem:[#allocation2 + $0x5e8] sm:$0xff]  ;;  %v476_v26 = vld [vmem:[#allocation2 + $0x5d0] sm:$0xff] }
  0x24   :  { %773 = vmatpush3.msra.mxu0 %v41_v32  ;;  %852 = vmatpush3.msra.mxu1 %v73_v34  ;;  %v387_v22 = vld [vmem:[%s1094_s1] sm:$0xff]  ;;  %v475_v27 = vld [vmem:[#allocation2 + $0x5b8] sm:$0xff]  ;;  %v565_v31 = vld [vmem:[#allocation2 + $0x668] sm:$0xff] }
  0x25   :  { %774 = vmatprep.subr.mxu0 %v56_v33  ;;  %853 = vmatprep.subr.mxu1 %v958_v0  ;;  %v474_v28 = vld [vmem:[#allocation2 + $0x5a0] sm:$0xff]  ;;  %v567_v30 = vld [vmem:[#allocation2 + $0x678] sm:$0xff]  ;;  %v562_v33 = vld [vmem:[#allocation2 + $0x650] sm:$0xff] }
  0x26   :  { %775 = vmatpush3.msra.mxu0 %v40_v35  ;;  %854 = vmatpush3.msra.mxu1 %v72_v37  ;;  %v568_v29 = vld [vmem:[#allocation2 + $0x680] sm:$0xff]  ;;  %v561_v34 = vld [vmem:[#allocation2 + $0x648] sm:$0xff]  ;;  %v559_v35 = vld [vmem:[#allocation2 + $0x638] sm:$0xff] }
  0x27   :  { %776 = vmatprep.subr.mxu0 %v55_v36  ;;  %855 = vmatprep.subr.mxu1 %v958_v0  ;;  %v564_v32 = vld [vmem:[#allocation2 + $0x660] sm:$0xff]  ;;  %v558_v36 = vld [vmem:[#allocation2 + $0x630] sm:$0xff] }
  0x28   :  { %777 = vmatpush3.msra.mxu0 %v39_v38  ;;  %856 = vmatpush3.msra.mxu1 %v71_v40  ;;  %v556_v37 = vld [vmem:[#allocation2 + $0x620] sm:$0xff] }
  0x29   :  { %778 = vmatprep.subr.mxu0 %v54_v39  ;;  %857 = vmatprep.subr.mxu1 %v958_v0  ;;  %v398_v38 = vld [vmem:[%s1096_s3 + $0x3] ss:$0 sm:$0xff] }
  0x2a   :  { %779 = vmatpush3.msra.mxu0 %v38_v41  ;;  %149 = vmatprep.mubr.f32.mxu0 %v34_v43  ;;  %v569_v43 = vld [vmem:[#allocation2 + $0x688] sm:$0xff] }
  0x2b   :  { %780 = vmatprep.subr.mxu0 %v53_v42  ;;  %858 = vmatpush3.msra.mxu1 %v70_v45  ;;  %v563_v45 = vld [vmem:[#allocation2 + $0x658] sm:$0xff] }
  0x2c   :  { %781 = vmatpush3.msra.mxu0 %v37_v44  ;;  %859 = vmatprep.subr.mxu1 %v958_v0  ;;  %v566_v44 = vld [vmem:[#allocation2 + $0x670] sm:$0xff] }
  0x2d   :  { %782 = vmatprep.subr.mxu0 %v52_v46  ;;  %860 = vmatpush3.msra.mxu1 %v69_v48  ;;  %v560_v46 = vld [vmem:[#allocation2 + $0x640] sm:$0xff]  ;;  %v557_v48 = vld [vmem:[#allocation2 + $0x628] sm:$0xff] }
  0x2e   :  { %783 = vmatpush3.msra.mxu0 %v36_v47  ;;  %861 = vmatprep.subr.mxu1 %v958_v0  ;;  %v555_v47 = vld [vmem:[#allocation2 + $0x618] sm:$0xff] }
  0x2f   :  { %150 = vmatmul.mubr.f32.vlgmr.msra.gmra.mxu0 %v33_v49  ;;  %862 = vmatpush3.msra.mxu1 %v68_v50  ;;  %v553_v49 = vld [vmem:[#allocation2 + $0x608] sm:$0xff]  ;;  %v552_v50 = vld [vmem:[#allocation2 + $0x600] sm:$0xff] }
  0x30   :  { %866 = vmatprep.subr.mxu0 %v958_v0  ;;  %864 = vmatmul.mubr.f32.vlgmr.msra.gmra.mxu1 %v35_v51  ;;  %v554_v51 = vld [vmem:[#allocation2 + $0x610] sm:$0xff] }
  0x31   :  { %878 = vmatprep.mubr.msk.f32.mxu0 %vm959_vm0, %v958_v0  ;;  %881 = vmatprep.subr.mxu1 %v958_v0 }
  0x32   :  { %889 = vmatprep.mubr.msk.f32.mxu1 %vm959_vm0, %v958_v0  ;;  %867 = vmatpush3.msra.mxu0 %v231_v52  ;;  %v478_v52 = vld [vmem:[%s1096_s3 + $0x4] ss:$0 sm:$0xff] }
  0x33   :  { %868 = vmatprep.subr.mxu0 %v958_v0  ;;  %882 = vmatpush3.msra.mxu1 %v311_v58 }
  0x34   :  { %869 = vmatpush3.msra.mxu0 %v230_v53  ;;  %883 = vmatprep.subr.mxu1 %v958_v0 }
  0x35   :  { %870 = vmatprep.subr.mxu0 %v958_v0  ;;  %884 = vmatpush3.msra.mxu1 %v310_v5 }
  0x36   :  { %871 = vmatpush3.msra.mxu0 %v229_v54  ;;  %885 = vmatprep.subr.mxu1 %v958_v0 }
  0x37   :  { %872 = vmatprep.subr.mxu0 %v958_v0  ;;  %886 = vmatpush3.msra.mxu1 %v309_v6 }
  0x38   :  { %873 = vmatpush3.msra.mxu0 %v228_v55  ;;  %887 = vmatprep.subr.mxu1 %v958_v0 }
  0x39   :  { %874 = vmatprep.subr.mxu0 %v958_v0  ;;  %888 = vmatpush3.msra.mxu1 %v308_v7 }
  0x3a   :  { %875 = vmatpush3.msra.mxu0 %v227_v56  ;;  %892 = vmatprep.subr.mxu1 %v958_v0  ;;  %v573_v56 = vlaneseq }
  0x3b   :  { %876 = vmatprep.subr.mxu0 %v958_v0 }
  0x3c   :  { %877 = vmatpush3.msra.mxu0 %v226_v57  ;;  %v574_v57 = vshrl.u32 %v573_v56, 7 }
  0x3d   :  { %899 = vmatprep.subr.mxu0 %v958_v0 }
  0x3e   :  { %v575_v58 = vsub.s32 0, %v574_v57 }
  0xef   :  { %v784_v59 = vpop.f32.mrf.mxu0 }
  0xf0   :  { %v221_v62 = vpop.f32.mrf.mxu1 }
  0xf1   :  { %v785_v60 = vpop.f32.mrf.mxu0 }
  0xf2   :  { %v786_v63 = vadd.f32 %v785_v60, %v784_v59  ;;  %v865_v1 = vpop.f32.mrf.mxu1  ;;  %v583_v59 = vsub.s32 2, %v574_v57  ;;  %v579_v60 = vsub.s32 1, %v574_v57 }
  0xf4   :  { %v152_v2 = vadd.f32 %v786_v63, %v84_v61 }
  0xf6   :  { %v222_v3 = vadd.f32 %v221_v62, %v152_v2 }
  0xf8   :  { %v225_v4 = vmax.f32 %v222_v3, 0.0 }
  0xfa   :  { %879 = vmatmul.mubr.msk.f32.vlgmr.msra.gmra.mxu0 %vm233_vm1, %v225_v4 }
  0xfb   :  { %907 = vmatprep.mubr.msk.f32.mxu0 %vm959_vm0, %v958_v0  ;;  %900 = vmatpush3.msra.mxu0 %v477_v20 }
  0xfc   :  { %901 = vmatprep.subr.mxu0 %v958_v0 }
  0xfd   :  { %902 = vmatpush3.msra.mxu0 %v476_v26 }
  0xfe   :  { %903 = vmatprep.subr.mxu0 %v958_v0 }
  0xff   :  { %904 = vmatpush3.msra.mxu0 %v475_v27 }
 0x100   :  { %905 = vmatprep.subr.mxu0 %v958_v0 }
 0x101   :  { %906 = vmatpush3.msra.mxu0 %v474_v28 }
 0x102   :  { %910 = vmatprep.subr.mxu0 %v958_v0 }
 0x1ba   :  { %v303_v9 = vpop.f32.mrf.mxu0 }
 0x1bb   :  { %v304_v10 = vadd.f32 %v303_v9, %v232_v8 }
 0x1bc   :  { %v880_v11 = vpop.f32.mrf.mxu0 }
 0x1bd   :  { %v307_v12 = vmax.f32 %v304_v10, 0.0 }
 0x1bf   :  { %890 = vmatmul.mubr.msk.f32.vlgmr.msra.gmra.mxu1 %vm313_vm2, %v307_v12 }
 0x1c0   :  { %896 = vmatprep.mubr.msk.f32.mxu1 %vm959_vm0, %v958_v0  ;;  %893 = vmatpush3.msra.mxu1 %v397_v18 }
 0x1c1   :  { %894 = vmatprep.subr.mxu1 %v958_v0 }
 0x1c2   :  { %895 = vmatpush3.msra.mxu1 %v396_v19 }
 0x1c3   :  { %611 = vmatprep.subr.mxu1 %v568_v29 }
 0x27f   :  { %v383_v14 = vpop.f32.mrf.mxu1 }
 0x280   :  { %v384_v15 = vadd.f32 %v383_v14, %v312_v13 }
 0x281   :  { %v891_v16 = vpop.f32.mrf.mxu1 }
 0x282   :  { %v388_v17 = vmul.f32 1.442695, %v384_v15  ;;  %735 = vst.msk [vmem:[%s1098_s5] sm:$0xff] %vm313_vm2, %v384_v15 }
 0x284   :  { %931 = vpow2.f32 %v388_v17 }
 0x291   :  { %v932_v21 = vpop.eup %931 }
 0x292   :  { %391 = vrot.lane.b32.xlu0 %v932_v21, %s960_s12 }
 0x304   :  { %v392_v23 = vpop.permute.xlu0 %391 }
 0x305   :  { %v394_v24 = vmul.f32 %v392_v23, %v387_v22 }
 0x307   :  { %v395_v25 = vadd.f32 %v394_v24, %v384_v15 }
 0x309   :  { %897 = vmatmul.mubr.msk.f32.vlgmr.msra.gmra.mxu1 %vm399_vm3, %v395_v25 }
 0x30a   :  { %655 = vmatprep.mubr.f32.mxu1 %v958_v0  ;;  %612 = vmatpush1.msra.mxu1 %v567_v30 }
 0x30b   :  { %613 = vmatprep.subr.mxu1 %v565_v31 }
 0x30c   :  { %614 = vmatpush1.msra.mxu1 %v564_v32 }
 0x30d   :  { %615 = vmatprep.subr.mxu1 %v562_v33 }
 0x30e   :  { %616 = vmatpush1.msra.mxu1 %v561_v34 }
 0x30f   :  { %617 = vmatprep.subr.mxu1 %v559_v35 }
 0x310   :  { %618 = vmatpush1.msra.mxu1 %v558_v36 }
 0x311   :  { %619 = vmatprep.subr.mxu1 %v556_v37 }
 0x312   :  { %620 = vmatpush1.msra.mxu1 %v555_v47 }
 0x313   :  { %621 = vmatprep.subr.mxu1 %v553_v49 }
 0x314   :  { %622 = vmatpush1.msra.mxu1 %v552_v50 }
 0x3c9   :  { %v469_v39 = vpop.f32.mrf.mxu1 }
 0x3ca   :  { %v470_v40 = vadd.f32 %v469_v39, %v398_v38 }
 0x3cb   :  { %v898_v41 = vpop.f32.mrf.mxu1 }
 0x3cc   :  { %v473_v42 = vmax.f32 %v470_v40, 0.0 }
 0x3ce   :  { %908 = vmatmul.mubr.msk.f32.vlgmr.msra.gmra.mxu0 %vm313_vm2, %v473_v42 }
 0x3cf   :  { %911 = vmatpush3.msra.mxu0 %v569_v43  ;;  %922 = vmatprep.mubr.msk.f32.mxu0 %vm959_vm0, %v958_v0 }
 0x3d0   :  { %912 = vmatprep.subr.mxu0 %v958_v0 }
 0x3d1   :  { %913 = vmatpush3.msra.mxu0 %v566_v44 }
 0x3d2   :  { %914 = vmatprep.subr.mxu0 %v958_v0 }
 0x3d3   :  { %915 = vmatpush3.msra.mxu0 %v563_v45 }
 0x3d4   :  { %916 = vmatprep.subr.mxu0 %v958_v0 }
 0x3d5   :  { %917 = vmatpush3.msra.mxu0 %v560_v46 }
 0x3d6   :  { %918 = vmatprep.subr.mxu0 %v958_v0 }
 0x3d7   :  { %919 = vmatpush3.msra.mxu0 %v557_v48 }
 0x3d8   :  { %920 = vmatprep.subr.mxu0 %v958_v0  ;;  %v749_v0 = vld [vmem:[%s1096_s3 + $0x5] ss:$8 sm:$0x7] }
 0x3d9   :  { %921 = vmatpush3.msra.mxu0 %v554_v51  ;;  %v576_v61 = vrot.slane %v749_v0, %v575_v58  ;;  %v584_v62 = vrot.slane %v749_v0, %v583_v59  ;;  %v580_v63 = vrot.slane %v749_v0, %v579_v60 }
 0x48e   :  { %v548_v53 = vpop.f32.mrf.mxu0 }
 0x48f   :  { %v549_v54 = vadd.f32 %v548_v53, %v478_v52 }
 0x490   :  { %v909_v55 = vpop.f32.mrf.mxu0 }
 0x491   :  { %750 = vmatmul.mubr.msk.f32.vlgmr.msra.gmra.mxu1 %vm233_vm1, %v549_v54  ;;  %923 = vmatmul.mubr.msk.f32.vlgmr.msra.gmra.mxu0 %vm233_vm1, %v549_v54 }
 0x551   :  { %v657_v1 = vpop.f32.mrf.mxu1  ;;  %v728_v2 = vpop.f32.mrf.mxu0 }
 0x552   :  { %v658_v3 = vadd.f32 %v657_v1, %v576_v61  ;;  %v729_v4 = vadd.f32 %v728_v2, %v584_v62 }
 0x553   :  { %v659_v5 = vpop.f32.mrf.mxu1  ;;  %v924_v6 = vpop.f32.mrf.mxu0 }
 0x554   :  { %732 = vst [vmem:[%s1097_s4] sm:$0xff] %v658_v3  ;;  %734 = vst [vmem:[%s1097_s4 + $0x10] sm:$0xff] %v729_v4  ;;  %v660_v7 = vadd.f32 %v659_v5, %v580_v63 }
 0x556   :  { %733 = vst [vmem:[%s1097_s4 + $0x8] sm:$0xff] %v660_v7 }
 0x557   :  { %744 = vsyncpa [#allocation3], 1 }

</bundles_post_ra>
